<compile_context>
chip_gen: v6e
topology: v6e:2x2x1
jax: 0.10.0
libtpu: 0.0.40
codegen_flags: <defaults>
</compile_context>

<pallas_src>
import jax
import jax.numpy as jnp
from jax.experimental import pallas as pl
from jax.experimental.pallas import tpu as pltpu


def _neg_fill_value(dtype):
    if jnp.issubdtype(dtype, jnp.floating):
        return float("-inf")
    return int(jnp.iinfo(dtype).min)


def _make_pool_kernel(hw, t_hw, neg_value):
    """Running global max over the spatial (lane) axis, tiled along lanes."""
    needs_mask = (hw % t_hw) != 0

    def pool_kernel(x_ref, o_ref, maxacc):
        s = pl.program_id(2)
        last = pl.num_programs(2) - 1

        @pl.when(s == 0)
        def _():
            maxacc[...] = jnp.full(maxacc.shape, neg_value, maxacc.dtype)

        xt = x_ref[0]                                        # (cc, t_hw), native dtype

        def fold(tile):
            maxacc[...] = jnp.maximum(
                maxacc[...], jnp.max(tile, axis=-1, keepdims=True))

        if needs_mask:
            # Only the ragged tail tile needs masking; keep the hot steps to a
            # single VPU max per element (compute stays hidden under the DMA).
            @pl.when(s != last)
            def _():
                fold(xt)

            @pl.when(s == last)
            def _():
                lane = jax.lax.broadcasted_iota(jnp.int32, xt.shape, 1)
                valid = (s * t_hw + lane) < hw
                fold(jnp.where(valid, xt, jnp.asarray(neg_value, dtype=xt.dtype)))
        else:
            fold(xt)

        @pl.when(s == last)
        def _():
            o_ref[0] = maxacc[...]

    return pool_kernel


def _mlp_kernel(pooled_ref, w1t_ref, w2t_ref, o_ref):
    """sigmoid(relu(pooled @ W1^T) @ W2^T) on a single VMEM block."""
    p = pooled_ref[...].astype(jnp.float32)                              # (B, C)
    h = jnp.dot(p, w1t_ref[...].astype(jnp.float32),
                preferred_element_type=jnp.float32)                      # (B, r)
    h = jnp.maximum(h, 0.0)                                              # ReLU
    logits = jnp.dot(h, w2t_ref[...].astype(jnp.float32),
                     preferred_element_type=jnp.float32)                 # (B, C)
    o_ref[...] = jax.nn.sigmoid(logits).astype(o_ref.dtype)


def _pick_tile_hw(hw, cc, itemsize, tile_bytes):
    """Largest lane-dense (multiple-of-128) tile with cc*t*itemsize <= tile_bytes."""
    cap = (tile_bytes // (itemsize * cc)) // 128 * 128
    cap = max(cap, 128)
    if hw <= cap:
        return hw        # a single step covers everything (full-extent block)
    return cap


def channel_attention(x, w1, w2, *, t_hw=None, tile_bytes=6 * 1024 * 1024):
    """x: (B, C, H, W); w1: (C//8, C) fc1 weight; w2: (C, C//8) fc2 weight.

    Returns sigmoid(fc2(relu(fc1(maxpool(x))))) with shape (B, C, 1, 1).
    """
    B, C, H, W = x.shape
    r = w1.shape[0]
    assert w1.shape == (r, C) and w2.shape == (C, r)
    HW = H * W
    x3 = x.reshape(B, C, HW)

    # Channel chunking: an extra "parallel" grid axis so both v7x TensorCores
    # get work even when B == 1.  At a fixed per-block byte budget this does
    # not change the total number of grid steps, so it is free on v5e/v6e.
    n_cc = 2 if (C % 16 == 0 and C >= 16) else 1
    cc = C // n_cc

    if t_hw is None:
        t_hw = _pick_tile_hw(HW, cc, x.dtype.itemsize, tile_bytes)
    n_s = pl.cdiv(HW, t_hw)

    # Explicit scoped-VMEM limit (v5e default is only 16 MiB and the x block
    # is double buffered).  Headroom covers the output block + scratch.
    block_bytes = cc * t_hw * x.dtype.itemsize
    vmem_limit = min(100 * 1024 * 1024,
                     max(32 * 1024 * 1024, 2 * block_bytes + 4 * 1024 * 1024))

    neg_value = _neg_fill_value(x.dtype)
    pooled = pl.pallas_call(
        _make_pool_kernel(HW, t_hw, neg_value),
        out_shape=jax.ShapeDtypeStruct((B, C, 1), x.dtype),
        grid_spec=pltpu.PrefetchScalarGridSpec(
            num_scalar_prefetch=0,
            grid=(B, n_cc, n_s),
            in_specs=[pl.BlockSpec((1, cc, t_hw), lambda b, c, s: (b, c, s))],
            out_specs=pl.BlockSpec((1, cc, 1), lambda b, c, s: (b, c, 0)),
            scratch_shapes=[pltpu.VMEM((cc, 1), x.dtype)],
        ),
        compiler_params=pltpu.CompilerParams(
            dimension_semantics=("parallel", "parallel", "arbitrary"),
            vmem_limit_bytes=vmem_limit),
    )(x3)

    # Tiny MLP (C -> C//8 -> C, no biases) + sigmoid on the pooled vector.
    full = lambda: (0, 0)
    att = pl.pallas_call(
        _mlp_kernel,
        out_shape=jax.ShapeDtypeStruct((B, C), x.dtype),
        in_specs=[pl.BlockSpec((B, C), full),
                  pl.BlockSpec((C, r), full),
                  pl.BlockSpec((r, C), full)],
        out_specs=pl.BlockSpec((B, C), full),
    )(pooled.reshape(B, C), jnp.transpose(w1), jnp.transpose(w2))
    return att.reshape(B, C, 1, 1)


def channel_attention_ref(x, w1, w2):
    """Pure-JAX reference mirroring the PyTorch forward."""
    pooled = jnp.max(x, axis=(2, 3))                 # AdaptiveMaxPool2d(1)
    h = jnp.maximum(pooled @ w1.T, 0.0)              # fc1 + ReLU
    att = jax.nn.sigmoid(h @ w2.T)                   # fc2 + sigmoid
    return att[:, :, None, None]


if __name__ == "__main__":
    key = jax.random.PRNGKey(0)

    # Case 1: in_planes=32 (hidden = C // 8 = 4), B=2, 16x16 feature map.
    B, C, H, W = 2, 32, 16, 16
    kx, k1, k2, key = jax.random.split(key, 4)
    x = jax.random.normal(kx, (B, C, H, W), jnp.float32)
    s1 = 1.0 / jnp.sqrt(C)
    w1 = jax.random.uniform(k1, (C // 8, C), jnp.float32, -s1, s1)     # Conv2d(C, C//8, 1)
    s2 = 1.0 / jnp.sqrt(C // 8)
    w2 = jax.random.uniform(k2, (C, C // 8), jnp.float32, -s2, s2)     # Conv2d(C//8, C, 1)

    out = jax.block_until_ready(channel_attention(x, w1, w2))
    ref = channel_attention_ref(x, w1, w2)
    assert out.shape == (B, C, 1, 1)
    assert jnp.allclose(out, ref, atol=1e-5, rtol=1e-5)

    # Case 2: exercises the ragged-tail masking path (HW % t_hw != 0), the
    # multi-step reduction, B == 1, and a channel count not divisible by 16.
    B2, C2, H2, W2 = 1, 24, 13, 13
    kx, k1, k2, key = jax.random.split(key, 4)
    x2 = jax.random.normal(kx, (B2, C2, H2, W2), jnp.float32)
    s1 = 1.0 / jnp.sqrt(C2)
    w1b = jax.random.uniform(k1, (C2 // 8, C2), jnp.float32, -s1, s1)
    s2 = 1.0 / jnp.sqrt(C2 // 8)
    w2b = jax.random.uniform(k2, (C2, C2 // 8), jnp.float32, -s2, s2)

    out2 = jax.block_until_ready(channel_attention(x2, w1b, w2b, t_hw=128))
    ref2 = channel_attention_ref(x2, w1b, w2b)
    assert out2.shape == (B2, C2, 1, 1)
    assert jnp.allclose(out2, ref2, atol=1e-5, rtol=1e-5)

    print("KERNEL_OK")
</pallas_src>

<mosaic_0001>
module attributes {stable_mosaic.version = 11 : i64} {
  func.func @pool_kernel(%arg0: i32, %arg1: i32, %arg2: i32, %arg3: memref<1x16x256xf32, #tpu.memory_space<vmem>>, %arg4: memref<1x16x1xf32, #tpu.memory_space<vmem>>, %arg5: memref<16x1xf32, #tpu.memory_space<vmem>>) attributes {dimension_semantics = [#tpu.dimension_semantics<parallel>, #tpu.dimension_semantics<parallel>, #tpu.dimension_semantics<arbitrary>], iteration_bounds = array<i64: 2, 2, 1>, scalar_prefetch = 0 : i64, scratch_operands = 1 : i64, tpu.core_type = #tpu.core_type<tc>, window_params = [{transform_indices = @transform_0, window_bounds = array<i64: 1, 16, 256>}, {transform_indices = @transform_1, window_bounds = array<i64: 1, 16, 1>}]} {
    %c0_i32 = arith.constant 0 : i32
    %0 = arith.cmpi eq, %arg2, %c0_i32 : i32
    %1 = arith.extui %0 : i1 to i32
    %c0_i32_0 = arith.constant 0 : i32
    %2 = arith.cmpi ne, %1, %c0_i32_0 : i32
    scf.if %2 {
      %cst_9 = arith.constant 0xFF800000 : f32
      %13 = vector.broadcast %cst_9 : f32 to vector<16x1xf32>
      %c0_10 = arith.constant 0 : index
      %c0_11 = arith.constant 0 : index
      %14 = vector.load %arg5[%c0_10, %c0_11] : memref<16x1xf32, #tpu.memory_space<vmem>>, vector<16x1xf32>
      tpu.vector_store %arg5[%c0_10, %c0_11], %13 {strides = array<i32>} : memref<16x1xf32, #tpu.memory_space<vmem>>, vector<16x1xf32>,
    } else {
    }
    %c0 = arith.constant 0 : index
    %c0_1 = arith.constant 0 : index
    %c0_2 = arith.constant 0 : index
    %3 = vector.load %arg3[%c0, %c0_1, %c0_2] : memref<1x16x256xf32, #tpu.memory_space<vmem>>, vector<1x16x256xf32>
    %4 = vector.shape_cast %3 : vector<1x16x256xf32> to vector<16x256xf32>
    %c0_3 = arith.constant 0 : index
    %c0_4 = arith.constant 0 : index
    %5 = vector.load %arg5[%c0_3, %c0_4] : memref<16x1xf32, #tpu.memory_space<vmem>>, vector<16x1xf32>
    %cst = arith.constant dense<0xFF800000> : vector<16xf32>
    %6 = vector.multi_reduction <maximumf>, %4, %cst [1] : vector<16x256xf32> to vector<16xf32>
    %7 = vector.shape_cast %6 : vector<16xf32> to vector<16x1xf32>
    %8 = arith.maximumf %5, %7 : vector<16x1xf32>
    %c0_5 = arith.constant 0 : index
    %c0_6 = arith.constant 0 : index
    %9 = vector.load %arg5[%c0_5, %c0_6] : memref<16x1xf32, #tpu.memory_space<vmem>>, vector<16x1xf32>
    tpu.vector_store %arg5[%c0_5, %c0_6], %8 {strides = array<i32>} : memref<16x1xf32, #tpu.memory_space<vmem>>, vector<16x1xf32>,
    %c0_i32_7 = arith.constant 0 : i32
    %10 = arith.cmpi eq, %arg2, %c0_i32_7 : i32
    %11 = arith.extui %10 : i1 to i32
    %c0_i32_8 = arith.constant 0 : i32
    %12 = arith.cmpi ne, %11, %c0_i32_8 : i32
    scf.if %12 {
      %c0_9 = arith.constant 0 : index
      %c0_10 = arith.constant 0 : index
      %13 = vector.load %arg5[%c0_9, %c0_10] : memref<16x1xf32, #tpu.memory_space<vmem>>, vector<16x1xf32>
      %c0_11 = arith.constant 0 : index
      %c0_12 = arith.constant 0 : index
      %c0_13 = arith.constant 0 : index
      %14 = vector.load %arg4[%c0_11, %c0_12, %c0_13] : memref<1x16x1xf32, #tpu.memory_space<vmem>>, vector<1x16x1xf32>
      %15 = vector.shape_cast %14 : vector<1x16x1xf32> to vector<16x1xf32>
      %16 = vector.shape_cast %13 : vector<16x1xf32> to vector<1x16x1xf32>
      tpu.vector_store %arg4[%c0_11, %c0_12, %c0_13], %16 {strides = array<i32>} : memref<1x16x1xf32, #tpu.memory_space<vmem>>, vector<1x16x1xf32>,
    } else {
    }
    return
  }
  func.func @transform_0(%arg0: i32, %arg1: i32, %arg2: i32) -> (i32, i32, i32) {
    %c0_i32 = arith.constant 0 : i32
    return %arg0, %arg1, %arg2 : i32, i32, i32
  }
  func.func @transform_1(%arg0: i32, %arg1: i32, %arg2: i32) -> (i32, i32, i32) {
    %c0_i32 = arith.constant 0 : i32
    %c0_i32_0 = arith.constant 0 : i32
    return %arg0, %arg1, %c0_i32 : i32, i32, i32
  }
}

</mosaic_0001>

<bundles_post_ra>
// kernel: tpu_custom_call.1
= control target key start
LH: loop header
LB: loop body
LE: loop exit
PB: predicated region body
PF: predicated region fallthrough
CT: control target
= control target key end

     0   :  { %6 = vsyncpa [#allocation4], 0  ;;  %s643_s0 = inlined_call_operand.hbm [shape: f32[2,32,256], index: 0, kind: input, shape index: {}]   ;;  %s644_s1 = inlined_call_operand.vmem [shape: f32[2,32,1], index: 1, kind: output, shape index: {}]  }
   0x1   :  { %8 = vsyncpa [#allocation4 + $0x1], 0  ;;  %s513_s6 = smov 0   ;;  %s515_s7 = smov 0  }
   0x2   :  { %s517_s8 = smov 0   ;;  %s519_s9 = smov 0  }
   0x3   :  { %s521_s10 = smov 0   ;;  %s523_s11 = smov 0  }
   0x4   :  { %s525_s12 = smov 0   ;;  %s527_s13 = smov 0  }
   0x5 LB: > { %s312_s14 = sadd.s32 4294967295, %s497_s13   ;;  %s29_s15 = sadd.s32 1, %s489_s11  ;;  %s497_s13 = sphi %s527_s13, %s14_s13   ;;  %s493_s12 = sphi %s525_s12, %s654_s12   ;;  %s489_s11 = sphi %s523_s11, %s653_s11   ;;  %s485_s10 = sphi %s521_s10, %s652_s10   ;;  %s481_s9 = sphi %s519_s9, %s651_s9   ;;  %s477_s8 = sphi %s517_s8, %s650_s8   ;;  %s473_s7 = sphi %s515_s7, %s649_s7   ;;  %s469_s6 = sphi %s513_s6, %s648_s6  }
   0x6   : > { %p31_p0 = scmp.ge.s32.totalorder %s29_s15, 2  ;;  %s33_s16 = sadd.s32 1, %s493_s12 }
   0x7   : > { %s44_s17 = sadd.s32 1, %s477_s8  ;;  %p51_p1 = scmp.ne.s32.totalorder %s477_s8, %s473_s7 }
   0x8   : > { %s656_s15 = smov (%p31_p0, %s29_s15), 0  ;;  %s658_s16 = smov (!%p31_p0, %s33_s16), %s493_s12 }
   0x9   : > { %s38_s18 = ssub.s32 %s489_s11, %s656_s15  ;;  %p52_p2 = scmp.eq.s32.totalorder %s497_s13, 0 }
   0xa   : > { %p35_p3 = scmp.ge.s32.totalorder %s658_s16, 2  ;;  %p57_p4 = scmp.ne.s32.totalorder %s473_s7, %s469_s6 }
   0xb   : > { %p564_p5 = por %p52_p2, %p51_p1  ;;  %p58_p6 = scmp.eq.s32.totalorder %s312_s14, 0 }
   0xc   : > { %s660_s16 = smov (%p35_p3, %s658_s16), 0  ;;  %p335_p8 = scmp.lt.s32.totalorder %s497_s13, 4 }
   0xd   : > { %p570_p7 = por %p58_p6, %p57_p4  ;;  %s37_s21 = ssub.s32 %s493_s12, %s660_s16 }
   0xe   : > { %s39_s22 = sor.u32 %s38_s18, %s37_s21  ;;  %s109_s23 = sand.u32 1, %s477_s8  }
   0xf   : > { %p42_p9 = scmp.eq.s32.totalorder %s39_s22, 0  ;;  %s316_s24 = sshll.u32 %s109_s23, 5 }
  0x10   : > { %s328_s25 = sshll.u32 %s489_s11, 2  ;;  %s319_s27 = sshll.u32 %s493_s12, 3 }
  0x11   : > { %s580_s26 = scalar_select %p42_p9, %s477_s8, %s44_s17  }
  0x12   : > { %s122_s28 = sadd.s32 %s328_s25, %s319_s27  ;;  %s113_s29 = scalar_lea.vmem [#allocation3], %s316_s24 }
  0x13   : > { %s125_s30 = sshll.u32 %s113_s29, 4  ;;  %s320_s2 = sshll.u32 %s122_s28, 7  ;;  %s126_s30 = int_to_ptr.vmem [resolvable:$true] %s125_s30 }
  0x14   : > { %s124_s5 = scalar_lea.hbm %s643_s0, %s320_s2  ;;  %p590_p10 = pnand %p335_p8, %p564_p5 }
  0x15   : > { %p321_p11 = scmp.ge.s32.totalorder %s497_s13, 1  ;;  %s110_s14 = scalar_lea.sflag [#allocation4], %s109_s23 }
  0x16   : > { %p405_p12 = pneg %p590_p10  ;;  %s416_s17 = scalar_lea.vmem %s126_s30, 512 }
  0x17   : > { %p417_p13 = scmp.ne.s32.totalorder %s126_s30, %s416_s17  ;;  %s499_s18 = smov [#allocation3]  }
  0x18   : > { %s421_s21 = sshll.u32 %s499_s18, 4  ;;  %s422_s21 = int_to_ptr.vmem [resolvable:$false] %s421_s21 }
  0x19   : > { %p419_p0 = pnand %p417_p13, %p405_p12  ;;  %s423_s22 = scalar_lea.vmem %s422_s21, 1024 }
  0x1a   : > { %p424_p2 = scmp.lt.s32.totalorder %s126_s30, %s422_s21  ;;  %p425_p3 = scmp.lt.s32.totalorder %s423_s22, %s416_s17 }
  0x1b   : > { %p420_p1 = pneg %p419_p0 }
  0x1c   : > { %p426_p4 = por %p425_p3, %p424_p2 }
  0x1e   : > { %p427_p5 = pnand %p426_p4, %p420_p1 }
  0x20   : > { %430 = shalt.err (!%p427_p5)
}
  0x21   : > { %s500_s19 = smov 256   ;;  %s501_s23 = smov 16  }
  0x22   : > { %334 = dma.hbm_to_vmem [thread:$0]  (!%p590_p10), %s124_s5, 512, %s126_s30, %s110_s14, %s500_s19, %s500_s19, %s501_s23  }
  0x23   : > { %p133_p6 = scmp.lt.s32.totalorder %s497_s13, 5 }
  0x25   : > { %p134_p8 = pnand %p321_p11, %p133_p6 }
  0x26   : > { %s139_s24 = sand.u32 (!%p134_p8), 1, %s473_s7  }
  0x27   : > { %137 = sbr.rel (%p134_p8) target bundleno = 201 (0xc9), region = 24  ;;  %s322_s25 = sshll.u32 (!%p134_p8), %s139_s24, 5 }
  0x28   : > { %s140_s27 = scalar_lea.sflag (!%p134_p8), [#allocation4], %s139_s24  ;;  %s143_s28 = scalar_lea.vmem (!%p134_p8), [#allocation3], %s322_s25 }
  0x2c   : > { %464 = dma.done.wait (%p570_p7), %s140_s27, 512  }
  0x2d   : > { %466 = vsyncadd (%p570_p7), %s140_s27, 4294966784  ;;  %vm182_vm0 = vcmask 7168   ;;  %v502_v0 = vmov -inf   ;;  %v185_v1 = vld [vmem:[%s143_s28] sm:$0xff]  ;;  %v186_v2 = vld [vmem:[%s143_s28 + $0x8] sm:$0xff]  ;;  %s323_s29 = sshll.u32 %s481_s9, 1 }
  0x2e   : > { %183 = vst.msk [vmem:[#allocation2] sm:$0xff] %vm182_vm0, %v502_v0  ;;  %184 = vst.msk [vmem:[#allocation2 + $0x8] sm:$0xff] %vm182_vm0, %v502_v0  ;;  %v187_v3 = vld [vmem:[%s143_s28 + $0x10] sm:$0xff]  ;;  %v191_v4 = vmax.f32 %v185_v1, %v186_v2  ;;  %v188_v5 = vld [vmem:[%s143_s28 + $0x18] sm:$0xff]  ;;  %p169_p9 = scmp.lt.s32.totalorder %s485_s10, 1  ;;  %p171_p7 = scmp.lt.s32.totalorder %s323_s29, 3 }
  0x2f   : > { %v194_v6 = vmax.f32 %v187_v3, %v188_v5 }
  0x30   : > { %192 = vmax.xlane.f32.xlu0 %v191_v4  ;;  %s662_s10 = smov (!%p169_p9, %s485_s10), 1  ;;  %s664_s29 = smov (!%p171_p7, %s323_s29), 3 }
  0x31   : > { %s324_s20 = sshll.u32 %s662_s10, 2 }
  0x32   : > { %s174_s30 = sadd.s32 %s324_s20, %s664_s29 }
  0x33   : > { %s325_s2 = sshll.u32 %s174_s30, 3 }
  0x34   : > { %195 = vmax.xlane.f32.xlu0 %v194_v6  ;;  %s176_s9 = scalar_lea.vmem %s644_s1, %s325_s2 }
  0x35   : > { %v189_v7 = vld [vmem:[#allocation2] sm:$0xff]  ;;  %v190_v10 = vld [vmem:[#allocation2 + $0x8] sm:$0xff] }
  0xb9   : > { %v193_v8 = vpop.xlane.xlu0 %192 }
  0xba   : > { %v197_v9 = vmax.f32 %v189_v7, %v193_v8 }
  0xbc   : > { %200 = vst.msk [vmem:[#allocation2] sm:$0xff] %vm182_vm0, %v197_v9 }
  0xbd   : > { %v196_v11 = vpop.xlane.xlu0 %195 }
  0xbe   : > { %v198_v12 = vmax.f32 %v190_v10, %v196_v11 }
  0xc0   : > { %201 = vst.msk [vmem:[#allocation2 + $0x8] sm:$0xff] %vm182_vm0, %v198_v12 }
  0xc3   : > { %v205_v13 = vld [vmem:[#allocation2] sm:$0xff] }
  0xc4   : > { %207 = vst.msk [vmem:[%s176_s9] sm:$0xff] %vm182_vm0, %v205_v13 }
  0xc7   : > { %v206_v14 = vld [vmem:[#allocation2 + $0x8] sm:$0xff] }
  0xc8   : > { %208 = vst.msk [vmem:[%s176_s9 + $0x8] sm:$0xff] %vm182_vm0, %v206_v14 }
  0xc9 PF: > { %s14_s13 = sadd.s32 1, %s497_s13   ;;  %s648_s6 = smov %s473_s7 }
  0xca   : > { %p11_p10 = scmp.ge.s32.totalorder %s14_s13, 6   ;;  %s649_s7 = smov %s477_s8 }
  0xcb   : > { %s650_s8 = smov %s580_s26  ;;  %s651_s9 = smov %s489_s11 }
  0xcc   : > { %s652_s10 = smov %s493_s12  ;;  %s653_s11 = smov %s656_s15 }
  0xcd   : > { %s654_s12 = smov %s660_s16  ;;  %13 = sbr.rel (!%p11_p10) target bundleno = 5 (0x5), region = 72 }
  0xd2   :  { %239 = vsyncpa [#allocation4], 1 }
  0xd3   :  { %241 = vsyncpa [#allocation4 + $0x1], 1 }

</bundles_post_ra>
